<compile_context>
chip_gen: v7x
topology: tpu7x:2x2x1
jax: 0.10.0
libtpu: 0.0.40
codegen_flags: <defaults>
</compile_context>

<pallas_src>
import math

import jax
import jax.numpy as jnp
from jax.experimental import pallas as pl
from jax.experimental.pallas import tpu as pltpu

# Shapes implied by the module constants / __init__.
B = 2          # small batch for the demo (module constant B=1; 2 exercises batching)
C = 64         # config.global_feature_dim
M = 20         # number of components (module constant M)
N = 8          # self.num_heads -> number of source-head proposals


def match_kernel(feat_ref, heads_ref, match_ref, exist_ref):
    """Full-batch matching in one invocation.

    feat_ref : (B, M, C) VMEM
    heads_ref: (N, C)    VMEM (batch-invariant weights, resident once)
    match_ref: (B, M, N) VMEM out
    exist_ref: (B, N)    VMEM out
    """
    f = feat_ref[...]                                  # (B, M, C) f32
    h = heads_ref[...]                                 # (N, C)    f32
    scale = 1.0 / math.sqrt(f.shape[-1])

    # In-VMEM broadcast of the weight block (no HBM duplication), then a
    # batched MXU matmul: (B, M, C) x (B, N, C) -> (B, M, N).
    hb = jnp.broadcast_to(h[None], (f.shape[0],) + h.shape)
    s = jnp.einsum("bmc,bnc->bmn", f, hb,
                   preferred_element_type=jnp.float32) * scale

    # Numerically stable softmax over the proposal axis (last dim), f32 path.
    s = s - jnp.max(s, axis=-1, keepdims=True)
    e = jnp.exp(s)
    denom = jnp.sum(e, axis=-1, keepdims=True)
    match = e * pl.reciprocal(denom, approx=False)     # EUP recip + VALU mul

    match_ref[...] = match.astype(match_ref.dtype)
    # existence = max over components (dim=1 in the torch code) -> (B, N)
    exist_ref[...] = jnp.max(match, axis=1).astype(exist_ref.dtype)


def abstract_net_forward(feature, spatial, source_heads):
    """Pallas-backed forward for the well-defined part of AbstractNet.forward.

    feature      : (B, M, C) float32
    spatial      : (B, M, C) float32 (unused by the executable part of the reference forward)
    source_heads : (N, C)    float32 parameter
    returns (match (B, M, N), existence (B, N))
    """
    # TODO(synk): the two 12-layer nn.Transformer decoders cannot be translated —
    # the reference forward feeds them undefined tensors (torch.randn() with no
    # shape); proposals are taken directly from the source_heads parameter.
    # TODO(synk): coordinate_decoder (Linear C->2) is never used in the
    # reference forward; omitted.
    del spatial

    b, m, c = feature.shape
    n = source_heads.shape[0]

    match, existence = pl.pallas_call(
        match_kernel,
        out_shape=(
            jax.ShapeDtypeStruct((b, m, n), jnp.float32),
            jax.ShapeDtypeStruct((b, n), jnp.float32),
        ),
        # Gridless single invocation: whole arrays are the block (satisfies the
        # (8,128) rule trivially); ~20 KB total, far under every VMEM limit.
        in_specs=[
            pl.BlockSpec(memory_space=pltpu.MemorySpace.VMEM),
            pl.BlockSpec(memory_space=pltpu.MemorySpace.VMEM),
        ],
        out_specs=(
            pl.BlockSpec(memory_space=pltpu.MemorySpace.VMEM),
            pl.BlockSpec(memory_space=pltpu.MemorySpace.VMEM),
        ),
    )(feature, source_heads)

    return match, existence


def _reference(feature, source_heads):
    """Pure-JAX reference for correctness checking."""
    proposals = jnp.broadcast_to(source_heads[None],
                                 (feature.shape[0],) + source_heads.shape)
    scores = jnp.einsum("bnc,bmc->bnm", feature, proposals) / math.sqrt(feature.shape[-1])
    match = jax.nn.softmax(scores, axis=-1)
    existence = jnp.max(match, axis=1)
    return match, existence


if __name__ == "__main__":
    key = jax.random.PRNGKey(0)
    k_feat, k_spat, k_heads = jax.random.split(key, 3)

    feature = jax.random.normal(k_feat, (B, M, C), dtype=jnp.float32)
    spatial = jax.random.normal(k_spat, (B, M, C), dtype=jnp.float32)
    # deterministic stand-in for nn.Parameter(torch.randn([num_heads, global_feature_dim]))
    source_heads = jax.random.normal(k_heads, (N, C), dtype=jnp.float32)

    match, existence = abstract_net_forward(feature, spatial, source_heads)
    jax.block_until_ready((match, existence))

    ref_match, ref_exist = _reference(feature, source_heads)
    assert match.shape == (B, M, N) and existence.shape == (B, N)
    assert jnp.allclose(match, ref_match, atol=1e-5, rtol=1e-5)
    assert jnp.allclose(existence, ref_exist, atol=1e-5, rtol=1e-5)
    # The reference forward literally returns `output_graph = 0`; we return the
    # computed match/existence tensors instead of that constant.
    print("KERNEL_OK")
</pallas_src>

<mosaic_0001>
module attributes {stable_mosaic.version = 11 : i64} {
  func.func @match_kernel(%arg0: memref<2x20x64xf32, #tpu.memory_space<vmem>>, %arg1: memref<8x64xf32, #tpu.memory_space<vmem>>, %arg2: memref<2x20x8xf32, #tpu.memory_space<vmem>>, %arg3: memref<2x8xf32, #tpu.memory_space<vmem>>) attributes {dimension_semantics = [], scalar_prefetch = 0 : i64, scratch_operands = 0 : i64, tpu.core_type = #tpu.core_type<tc>} {
    %c0 = arith.constant 0 : index
    %c0_0 = arith.constant 0 : index
    %c0_1 = arith.constant 0 : index
    %0 = vector.load %arg0[%c0, %c0_0, %c0_1] : memref<2x20x64xf32, #tpu.memory_space<vmem>>, vector<2x20x64xf32>
    %c0_2 = arith.constant 0 : index
    %c0_3 = arith.constant 0 : index
    %1 = vector.load %arg1[%c0_2, %c0_3] : memref<8x64xf32, #tpu.memory_space<vmem>>, vector<8x64xf32>
    %2 = vector.shape_cast %1 : vector<8x64xf32> to vector<1x8x64xf32>
    %3 = vector.shape_cast %2 : vector<1x8x64xf32> to vector<1x8x64xf32>
    %4 = vector.broadcast %3 : vector<1x8x64xf32> to vector<2x8x64xf32>
    "tpu.trace_start"() <{level = 10 : i32, message = "bmc,bnc->bmn"}> : () -> ()
    %cst = arith.constant dense<0.000000e+00> : vector<2x20x8xf32>
    %5 = tpu.matmul %0, %4, %cst {dimension_numbers = #tpu.dot_dimension_numbers<[2], [2], [1], [1], [0, 0, 0, 1, 1, 1], [0], [0]>} : vector<2x20x64xf32>, vector<2x8x64xf32>, vector<2x20x8xf32> -> vector<2x20x8xf32>
    "tpu.trace_stop"() : () -> ()
    %cst_4 = arith.constant 1.250000e-01 : f32
    %6 = vector.broadcast %cst_4 : f32 to vector<2x20x8xf32>
    %7 = arith.mulf %5, %6 : vector<2x20x8xf32>
    %cst_5 = arith.constant dense<0xFF800000> : vector<2x20xf32>
    %8 = vector.multi_reduction <maximumf>, %7, %cst_5 [2] : vector<2x20x8xf32> to vector<2x20xf32>
    %9 = vector.shape_cast %8 : vector<2x20xf32> to vector<2x20x1xf32>
    %10 = vector.broadcast %9 : vector<2x20x1xf32> to vector<2x20x8xf32>
    %11 = arith.subf %7, %10 : vector<2x20x8xf32>
    %12 = math.exp %11 : vector<2x20x8xf32>
    %cst_6 = arith.constant dense<0.000000e+00> : vector<2x20xf32>
    %13 = vector.multi_reduction <add>, %12, %cst_6 [2] : vector<2x20x8xf32> to vector<2x20xf32>
    %14 = vector.shape_cast %13 : vector<2x20xf32> to vector<2x20x1xf32>
    %15 = tpu.reciprocal %14 : vector<2x20x1xf32> -> vector<2x20x1xf32>
    %16 = vector.broadcast %15 : vector<2x20x1xf32> to vector<2x20x8xf32>
    %17 = arith.mulf %12, %16 : vector<2x20x8xf32>
    %c0_7 = arith.constant 0 : index
    %c0_8 = arith.constant 0 : index
    %c0_9 = arith.constant 0 : index
    %18 = vector.load %arg2[%c0_7, %c0_8, %c0_9] : memref<2x20x8xf32, #tpu.memory_space<vmem>>, vector<2x20x8xf32>
    tpu.vector_store %arg2[%c0_7, %c0_8, %c0_9], %17 {strides = array<i32>} : memref<2x20x8xf32, #tpu.memory_space<vmem>>, vector<2x20x8xf32>,
    %cst_10 = arith.constant dense<0xFF800000> : vector<2x8xf32>
    %19 = vector.multi_reduction <maximumf>, %17, %cst_10 [1] : vector<2x20x8xf32> to vector<2x8xf32>
    %c0_11 = arith.constant 0 : index
    %c0_12 = arith.constant 0 : index
    %20 = vector.load %arg3[%c0_11, %c0_12] : memref<2x8xf32, #tpu.memory_space<vmem>>, vector<2x8xf32>
    tpu.vector_store %arg3[%c0_11, %c0_12], %19 {strides = array<i32>} : memref<2x8xf32, #tpu.memory_space<vmem>>, vector<2x8xf32>,
    return
  }
}

</mosaic_0001>

<bundles_post_ra>
// kernel: tpu_custom_call.1
= control target key start
LH: loop header
LB: loop body
LE: loop exit
PB: predicated region body
PF: predicated region fallthrough
CT: control target
= control target key end

     0   :  { %vm21_vm0 = vcmask 523264   ;;  %v419_v1 = vmov 0.0   ;;  %s525_s0 = inlined_call_operand.vmem [shape: f32[2,20,64], index: 0, kind: input, shape index: {}]   ;;  %s526_s1 = inlined_call_operand.vmem [shape: f32[8,64], index: 1, kind: input, shape index: {}]   ;;  %s527_s2 = inlined_call_operand.vmem [shape: f32[2,20,8], index: 2, kind: output, shape index: {0}]   ;;  %s528_s3 = inlined_call_operand.hbm [shape: f32[2,8], index: 3, kind: output, shape index: {1}]  }
   0x1   :  { %v20_v0 = vld [vmem:[%s526_s1] sm:$0xff]  ;;  %346 = vmatprep.subr.mxu0 %v419_v1  ;;  %357 = vmatprep.subr.mxu1 %v419_v1  ;;  %v17_v3 = vld [vmem:[%s525_s0 + $0x18] sm:$0xff] }
   0x2   :  { %347 = vmatpush3.xpose.msk.msra.mxu0 %vm21_vm0, %v20_v0  ;;  %358 = vmatpush3.xpose.msk.msra.mxu1 %vm21_vm0, %v20_v0  ;;  %v14_v2 = vld [vmem:[%s525_s0] sm:$0xff] }
   0x3   :  { %9 = vsyncpa [#allocation3], 0  ;;  %vm420_vm1 = vmmov 0   ;;  %v15_v4 = vld [vmem:[%s525_s0 + $0x8] sm:$0xff]  ;;  %v18_v5 = vld [vmem:[%s525_s0 + $0x20] sm:$0xff]  ;;  %vm209_vm2 = vcmask 64512  }
   0x4   :  { %348 = vmatprep.mubr.msk.f32.mxu0 %vm420_vm1, %v419_v1  ;;  %359 = vmatprep.mubr.msk.f32.mxu1 %vm420_vm1, %v419_v1  ;;  %v16_v6 = vld [vmem:[%s525_s0 + $0x10] sm:$0xf]  ;;  %v19_v7 = vld [vmem:[%s525_s0 + $0x28] sm:$0xf]  ;;  %vm216_vm3 = vcmask 60416   ;;  %s421_s9 = smov [#allocation2]  }
   0x5   :  { %349 = vmatmul.mubr.msk.f32.vlgmr.msra.gmra.mrb[0].mxu0 %vm21_vm0, %v14_v2  ;;  %360 = vmatmul.mubr.msk.f32.vlgmr.msra.gmra.mrb[0].mxu1 %vm21_vm0, %v17_v3  ;;  %s320_s10 = sshll.u32 %s421_s9, 4  ;;  %vm307_vm4 = vcmask 1041409   ;;  %vm310_vm5 = vcmask 58368   ;;  %s321_s10 = int_to_ptr.vmem [resolvable:$true] %s320_s10 }
   0x6   :  { %351 = vmatprep.mubr.msk.f32.mxu0 %vm420_vm1, %v419_v1  ;;  %362 = vmatprep.mubr.msk.f32.mxu1 %vm420_vm1, %v419_v1  ;;  %p400_p1 = scmp.lt.s32.totalorder %s321_s10, %s321_s10 }
   0x9   :  { %352 = vmatmul.mubr.msk.f32.gmra.mrb[2].mxu0 %vm21_vm0, %v15_v4  ;;  %363 = vmatmul.mubr.msk.f32.gmra.mrb[2].mxu1 %vm21_vm0, %v18_v5 }
   0xa   :  { %354 = vmatprep.mubr.msk.f32.mxu0 %vm420_vm1, %v419_v1  ;;  %365 = vmatprep.mubr.msk.f32.mxu1 %vm420_vm1, %v419_v1 }
   0xd   :  { %355 = vmatmul.mubr.msk.f32.gmra.mrb[4].mxu0 %vm21_vm0, %v16_v6  ;;  %366 = vmatmul.mubr.msk.f32.gmra.mrb[4].mxu1 %vm21_vm0, %v19_v7 }
  0xd8   :  { %v100_v8 = vpop.f32.mrb[0].mxu0  ;;  %v189_v9 = vpop.f32.mrb[0].mxu1 }
  0xd9   :  { %v203_v10 = vmul.f32 0.125, %v100_v8  ;;  %v206_v11 = vmul.f32 0.125, %v189_v9  ;;  %v350_v12 = vpop.f32.mrb[1].mxu0  ;;  %v361_v13 = vpop.f32.mrb[1].mxu1 }
  0xdb   :  { %v220_v14 = vsel %vm209_vm2, %v206_v11, -inf  ;;  %v210_v15 = vsel %vm209_vm2, %v203_v10, -inf }
  0xdc   :  { %221 = vmax.xlane.f32.xlu1 %v220_v14  ;;  %211 = vmax.xlane.f32.xlu0 %v210_v15  ;;  %v105_v16 = vpop.f32.mrb[2].mxu0  ;;  %v194_v17 = vpop.f32.mrb[2].mxu1 }
  0xdd   :  { %v353_v18 = vpop.f32.mrb[3].mxu0  ;;  %v364_v19 = vpop.f32.mrb[3].mxu1  ;;  %v204_v26 = vmul.f32 0.125, %v105_v16  ;;  %v207_v27 = vmul.f32 0.125, %v194_v17 }
  0xdf   :  { %v223_v30 = vsel %vm209_vm2, %v207_v27, -inf  ;;  %v213_v31 = vsel %vm209_vm2, %v204_v26, -inf }
  0xe0   :  { %v110_v20 = vpop.f32.mrb[4].mxu0  ;;  %v199_v21 = vpop.f32.mrb[4].mxu1 }
  0xe1   :  { %v205_v22 = vmul.f32 0.125, %v110_v20  ;;  %v208_v23 = vmul.f32 0.125, %v199_v21  ;;  %v356_v24 = vpop.f32.mrb[5].mxu0  ;;  %v367_v25 = vpop.f32.mrb[5].mxu1 }
  0xe3   :  { %v226_v28 = vsel %vm216_vm3, %v208_v23, -inf  ;;  %v217_v29 = vsel %vm216_vm3, %v205_v22, -inf }
  0xe4   :  { %227 = vmax.xlane.f32.xlu1 %v226_v28  ;;  %218 = vmax.xlane.f32.xlu0 %v217_v29 }
  0xe8   :  { %224 = vmax.xlane.f32.xlu1 %v223_v30  ;;  %214 = vmax.xlane.f32.xlu0 %v213_v31 }
 0x169   :  { %v222_v32 = vpop.xlane.xlu1 %221  ;;  %v212_v33 = vpop.xlane.xlu0 %211 }
 0x16a   :  { %v232_v34 = vsub.f32 %v206_v11, %v222_v32  ;;  %v229_v35 = vsub.f32 %v203_v10, %v212_v33 }
 0x16c   :  { %v235_v36 = vmul.f32 1.442695, %v229_v35  ;;  %v241_v37 = vmul.f32 1.442695, %v232_v34 }
 0x16e   :  { %371 = vpow2.f32 %v235_v36 }
 0x16f   :  { %373 = vpow2.f32 %v241_v37 }
 0x171   :  { %v228_v38 = vpop.xlane.xlu1 %227  ;;  %v219_v39 = vpop.xlane.xlu0 %218 }
 0x172   :  { %v234_v40 = vsub.f32 %v208_v23, %v228_v38  ;;  %v231_v41 = vsub.f32 %v205_v22, %v219_v39 }
 0x174   :  { %v239_v42 = vmul.f32 1.442695, %v231_v41  ;;  %v245_v43 = vmul.f32 1.442695, %v234_v40 }
 0x175   :  { %v225_v44 = vpop.xlane.xlu1 %224  ;;  %v215_v45 = vpop.xlane.xlu0 %214 }
 0x176   :  { %v233_v46 = vsub.f32 %v207_v27, %v225_v44  ;;  %v230_v47 = vsub.f32 %v204_v26, %v215_v45  ;;  %375 = vpow2.f32 %v239_v42 }
 0x177   :  { %377 = vpow2.f32 %v245_v43 }
 0x178   :  { %v237_v48 = vmul.f32 1.442695, %v230_v47  ;;  %v372_v49 = vpop.eup %371  ;;  %v243_v50 = vmul.f32 1.442695, %v233_v46 }
 0x179   :  { %v247_v51 = vsel %vm209_vm2, %v372_v49, 0.0  ;;  %v374_v52 = vpop.eup %373 }
 0x17a   :  { %379 = vpow2.f32 %v237_v48  ;;  %248 = vadd.xlane.f32.xlu0 %v247_v51  ;;  %v256_v53 = vsel %vm209_vm2, %v374_v52, 0.0 }
 0x17b   :  { %381 = vpow2.f32 %v243_v50 }
 0x17e   :  { %257 = vadd.xlane.f32.xlu0 %v256_v53 }
 0x180   :  { %v376_v54 = vpop.eup %375 }
 0x181   :  { %v253_v55 = vsel %vm216_vm3, %v376_v54, 0.0  ;;  %v378_v56 = vpop.eup %377 }
 0x182   :  { %254 = vadd.xlane.f32.xlu1 %v253_v55  ;;  %v262_v58 = vsel %vm216_vm3, %v378_v56, 0.0 }
 0x184   :  { %v380_v57 = vpop.eup %379 }
 0x185   :  { %v250_v59 = vsel %vm209_vm2, %v380_v57, 0.0  ;;  %v382_v60 = vpop.eup %381 }
 0x186   :  { %263 = vadd.xlane.f32.xlu1 %v262_v58  ;;  %251 = vadd.xlane.f32.xlu0 %v250_v59  ;;  %v259_v61 = vsel %vm209_vm2, %v382_v60, 0.0 }
 0x18a   :  { %260 = vadd.xlane.f32.xlu1 %v259_v61 }
 0x207   :  { %v249_v62 = vpop.xlane.xlu0 %248 }
 0x208   :  { %383 = vrcp.f32 %v249_v62 }
 0x20b   :  { %v258_v63 = vpop.xlane.xlu0 %257 }
 0x20c   :  { %385 = vrcp.f32 %v258_v63 }
 0x20f   :  { %v255_v0 = vpop.xlane.xlu1 %254 }
 0x210   :  { %387 = vrcp.f32 %v255_v0 }
 0x212   :  { %v384_v1 = vpop.eup %383 }
 0x213   :  { %v271_v2 = vmul.f32 %v384_v1, %v372_v49  ;;  %v264_v3 = vpop.xlane.xlu1 %263  ;;  %v252_v4 = vpop.xlane.xlu0 %251 }
 0x214   :  { %389 = vrcp.f32 %v264_v3 }
 0x215   :  { %277 = vst.msk [vmem:[%s527_s2] sm:$0xff] %vm209_vm2, %v271_v2  ;;  %391 = vrcp.f32 %v252_v4  ;;  %v283_v14 = vsel %vm209_vm2, %v271_v2, -inf }
 0x216   :  { %v386_v5 = vpop.eup %385 }
 0x217   :  { %v274_v6 = vmul.f32 %v386_v5, %v374_v52  ;;  %v261_v7 = vpop.xlane.xlu1 %260 }
 0x218   :  { %393 = vrcp.f32 %v261_v7 }
 0x219   :  { %280 = vst.msk [vmem:[%s527_s2 + $0x18] sm:$0xff] %vm209_vm2, %v274_v6  ;;  %v294_v20 = vsel %vm209_vm2, %v274_v6, -inf }
 0x21a   :  { %v388_v8 = vpop.eup %387 }
 0x21b   :  { %v273_v9 = vmul.f32 %v388_v8, %v376_v54 }
 0x21d   :  { %279 = vst.msk [vmem:[%s527_s2 + $0x10] sm:$0xf] %vm216_vm3, %v273_v9  ;;  %v285_v11 = vsel %vm216_vm3, %v273_v9, -inf }
 0x21e   :  { %v390_v10 = vpop.eup %389  ;;  %v286_v16 = vmax.f32 %v283_v14, %v285_v11 }
 0x21f   :  { %v392_v12 = vpop.eup %391  ;;  %v276_v13 = vmul.f32 %v390_v10, %v378_v56 }
 0x220   :  { %v272_v15 = vmul.f32 %v392_v12, %v380_v57 }
 0x221   :  { %282 = vst.msk [vmem:[%s527_s2 + $0x28] sm:$0xf] %vm216_vm3, %v276_v13  ;;  %v296_v17 = vsel %vm216_vm3, %v276_v13, -inf }
 0x222   :  { %v394_v18 = vpop.eup %393  ;;  %278 = vst.msk [vmem:[%s527_s2 + $0x8] sm:$0xff] %vm209_vm2, %v272_v15  ;;  %v284_v19 = vsel %vm209_vm2, %v272_v15, -inf  ;;  %v297_v23 = vmax.f32 %v294_v20, %v296_v17 }
 0x223   :  { %v275_v21 = vmul.f32 %v394_v18, %v382_v60  ;;  %v287_v22 = vmax.f32 %v286_v16, %v284_v19 }
 0x225   :  { %281 = vst.msk [vmem:[%s527_s2 + $0x20] sm:$0xff] %vm209_vm2, %v275_v21  ;;  %v295_v24 = vsel %vm209_vm2, %v275_v21, -inf  ;;  %v288_v25 = vrot.slane %v287_v22, 4  ;;  %s395_s2 = scalar_lea.vmem %s321_s10, 32 }
 0x226   :  { %v298_v26 = vmax.f32 %v297_v23, %v295_v24  ;;  %p396_p0 = scmp.ne.s32.totalorder %s321_s10, %s395_s2  ;;  %p401_p2 = scmp.lt.s32.totalorder %s395_s2, %s395_s2 }
 0x227   :  { %v289_v27 = vmax.f32 %v287_v22, %v288_v25 }
 0x228   :  { %v299_v28 = vrot.slane %v298_v26, 4  ;;  %p402_p3 = por %p401_p2, %p400_p1 }
 0x229   :  { %v290_v29 = vrot.slane %v289_v27, 2 }
 0x22a   :  { %v300_v30 = vmax.f32 %v298_v26, %v299_v28  ;;  %p403_p4 = pnand %p402_p3, %p396_p0 }
 0x22b   :  { %v291_v31 = vmax.f32 %v289_v27, %v290_v29 }
 0x22c   :  { %v301_v32 = vrot.slane %v300_v30, 2 }
 0x22d   :  { %v292_v33 = vrot.slane %v291_v31, 1 }
 0x22e   :  { %v302_v34 = vmax.f32 %v300_v30, %v301_v32 }
 0x22f   :  { %v293_v36 = vmax.f32 %v291_v31, %v292_v33 }
 0x230   :  { %v303_v35 = vrot.slane %v302_v34, 1 }
 0x232   :  { %v304_v37 = vmax.f32 %v302_v34, %v303_v35 }
 0x234   :  { %v308_v38 = vsel %vm307_vm4, %v304_v37, %v293_v36 }
 0x235   :  { %311 = vst.msk [vmem:[#allocation2] sm:$0x3] %vm310_vm5, %v308_v38 }
 0x236   :  { %406 = shalt.err (!%p403_p4)
}
 0x237   :  { %s407_s13 = scalar_lea.hbm %s528_s3, 32 }
 0x238   :  { %p408_p5 = scmp.ne.s32.totalorder %s528_s3, %s407_s13  ;;  %p411_p6 = scmp.lt.u32.totalorder %s407_s13, %s528_s3 }
 0x23a   :  { %p413_p7 = pnand %p411_p6, %p408_p5 }
 0x23c   :  { %416 = shalt.err (!%p413_p7)
}
 0x23d   :  { %323 = dma.vmem_to_hbm [thread:$0]  %s321_s10, 32, %s528_s3, [#allocation3]  }
 0x23e   :  { %417 = dma.done.wait [#allocation3], 32  }
 0x23f   :  { %418 = vsyncadd [#allocation3], 4294967264 }
 0x240   :  { %329 = vsyncpa [#allocation3], 1 }

</bundles_post_ra>
